<compile_context>
chip_gen: v6e
topology: v6e:2x2x1
jax: 0.10.0
libtpu: 0.0.40
codegen_flags: <defaults>
</compile_context>

<pallas_src>
import math

import jax
import jax.numpy as jnp
from jax.experimental import pallas as pl
from jax.experimental.pallas import tpu as pltpu


# ----------------------------------------------------------------------------- Pallas kernel
def _pos_emb_kernel(t_ref, freq_ref, phase_ref, o_ref):
    # t_ref:     (tb, 1)    timesteps for this batch tile
    # freq_ref:  (1, dim)   duplicated frequency table [freqs, freqs]
    # phase_ref: (1, dim)   phase table [0...0, pi/2...pi/2]  (cos(x) == sin(x + pi/2))
    # o_ref:     (tb, dim)  output embedding tile (lane-dense, single unmasked full-width store)
    t = t_ref[...].astype(jnp.float32)                    # (tb, 1)
    ang = t * freq_ref[...] + phase_ref[...]              # (tb, dim)  VPU broadcast FMA
    o_ref[...] = jnp.sin(ang).astype(o_ref.dtype)         # 1 EUP transcendental / element


# ----------------------------------------------------------------------------- tile selection
def _pick_tile(B, dim, block_b, out_itemsize):
    # Cap so the double-buffered output tile stays <= ~16 MiB (fits default scoped VMEM on all
    # generations, incl. v7x's 64 MiB physical VMEM).
    vmem_cap = (16 * 1024 * 1024) // (2 * dim * out_itemsize)
    vmem_cap = max(8, (vmem_cap // 8) * 8)
    cap = min(block_b, vmem_cap)
    if B <= cap:
        # A single full-extent block needs no (8,128) rounding and no padding.  If B is large
        # enough, split it in two parallel programs so v7x's second TensorCore isn't idle.
        if B >= 4096 and B % 16 == 0 and (B // 2) <= cap:
            return B // 2
        return B
    return cap


# ----------------------------------------------------------------------------- wrapper
def positional_embedding(timesteps, dim, *, max_timesteps=1000, block_b=8192,
                         out_dtype=jnp.float32):
    """Sinusoidal timestep embedding matching the PyTorch `PositionalEmbedding` module.

    timesteps: (B,) array (int or float); returns (B, dim) in `out_dtype`.
    """
    B = timesteps.shape[0]
    half = dim // 2
    assert dim % 2 == 0 and half >= 2, "dim must be even and >= 4"

    # Host-side tables (tiny, computed once):
    #   freqs  = exp(arange(half) * -log(max_timesteps)/(half-1))    (matches the torch module)
    #   f_full = [freqs, freqs]           phase = [0..0, pi/2..pi/2]
    scale = math.log(max_timesteps) / (half - 1)
    freqs = jnp.exp(-scale * jnp.arange(half, dtype=jnp.float32))
    f_full = jnp.concatenate([freqs, freqs]).reshape(1, dim)
    phase = jnp.concatenate(
        [jnp.zeros((half,), jnp.float32),
         jnp.full((half,), math.pi / 2, jnp.float32)]).reshape(1, dim)

    out_itemsize = jnp.dtype(out_dtype).itemsize
    tb = _pick_tile(B, dim, block_b, out_itemsize)
    grid = pl.cdiv(B, tb)
    Bp = grid * tb

    # Only the tiny (B, 1) timestep column is padded (if the grid is ragged); the (B, dim)
    # output is NOT padded/sliced — the last block's store is masked by Pallas.
    t2 = timesteps.astype(jnp.float32).reshape(B, 1)
    if Bp != B:
        t2 = jnp.pad(t2, ((0, Bp - B), (0, 0)))

    cost = pl.CostEstimate(
        flops=2 * B * dim,
        transcendentals=B * dim,
        bytes_accessed=B * dim * out_itemsize + Bp * 4 + 2 * dim * 4,
    )

    out = pl.pallas_call(
        _pos_emb_kernel,
        out_shape=jax.ShapeDtypeStruct((B, dim), out_dtype),
        grid=(grid,),
        in_specs=[
            pl.BlockSpec((tb, 1), lambda i: (i, 0)),       # timesteps tile (sublane-only)
            pl.BlockSpec((1, dim), lambda i: (0, 0)),      # freq table (constant block idx)
            pl.BlockSpec((1, dim), lambda i: (0, 0)),      # phase table (constant block idx)
        ],
        out_specs=pl.BlockSpec((tb, dim), lambda i: (i, 0)),
        compiler_params=pltpu.CompilerParams(dimension_semantics=("parallel",)),
        cost_estimate=cost,
    )(t2, f_full, phase)
    return out


# ----------------------------------------------------------------------------- pure-JAX reference
def positional_embedding_ref(timesteps, dim, *, max_timesteps=1000):
    half = dim // 2
    scale = math.log(max_timesteps) / (half - 1)
    freqs = jnp.exp(-scale * jnp.arange(half, dtype=jnp.float32))
    ang = timesteps.astype(jnp.float32)[:, None] * freqs[None, :]
    return jnp.concatenate([jnp.sin(ang), jnp.cos(ang)], axis=-1)


# ----------------------------------------------------------------------------- main
if __name__ == "__main__":
    B = 8
    dim = 128
    max_timesteps = 1000

    key = jax.random.PRNGKey(0)
    # Deterministic "diffusion timestep" inputs (integers in [0, max_timesteps)).
    t = jax.random.randint(key, (B,), 0, max_timesteps).astype(jnp.float32)

    out = positional_embedding(t, dim, max_timesteps=max_timesteps)
    out = jax.block_until_ready(out)

    ref = positional_embedding_ref(t, dim, max_timesteps=max_timesteps)

    assert out.shape == (B, dim), out.shape
    assert bool(jnp.all(jnp.isfinite(out)))
    # cos(x) is computed as sin(x + pi/2); for angles up to max_timesteps the f32 argument
    # rounding admits ~1e-4 absolute error, so compare with a 5e-4 tolerance.
    err = float(jnp.max(jnp.abs(out - ref)))
    assert err < 5e-4, err
    print("KERNEL_OK")
</pallas_src>

<mosaic_0001>
module attributes {stable_mosaic.version = 11 : i64} {
  func.func @_pos_emb_kernel(%arg0: i32, %arg1: memref<8x1xf32, #tpu.memory_space<vmem>>, %arg2: memref<1x128xf32, #tpu.memory_space<vmem>>, %arg3: memref<1x128xf32, #tpu.memory_space<vmem>>, %arg4: memref<8x128xf32, #tpu.memory_space<vmem>>) attributes {dimension_semantics = [#tpu.dimension_semantics<parallel>], iteration_bounds = array<i64: 1>, scalar_prefetch = 0 : i64, scratch_operands = 0 : i64, tpu.core_type = #tpu.core_type<tc>, window_params = [{transform_indices = @transform_0, window_bounds = array<i64: 8, 1>}, {pipeline_mode = #tpu.pipeline_mode<synchronous>, transform_indices = @transform_1, window_bounds = array<i64: 1, 128>}, {pipeline_mode = #tpu.pipeline_mode<synchronous>, transform_indices = @transform_2, window_bounds = array<i64: 1, 128>}, {transform_indices = @transform_3, window_bounds = array<i64: 8, 128>}]} {
    %c0 = arith.constant 0 : index
    %c0_0 = arith.constant 0 : index
    %0 = vector.load %arg1[%c0, %c0_0] : memref<8x1xf32, #tpu.memory_space<vmem>>, vector<8x1xf32>
    %c0_1 = arith.constant 0 : index
    %c0_2 = arith.constant 0 : index
    %1 = vector.load %arg2[%c0_1, %c0_2] : memref<1x128xf32, #tpu.memory_space<vmem>>, vector<1x128xf32>
    %2 = vector.broadcast %0 : vector<8x1xf32> to vector<8x128xf32>
    %3 = vector.broadcast %1 : vector<1x128xf32> to vector<8x128xf32>
    %4 = arith.mulf %2, %3 : vector<8x128xf32>
    %c0_3 = arith.constant 0 : index
    %c0_4 = arith.constant 0 : index
    %5 = vector.load %arg3[%c0_3, %c0_4] : memref<1x128xf32, #tpu.memory_space<vmem>>, vector<1x128xf32>
    %6 = vector.broadcast %5 : vector<1x128xf32> to vector<8x128xf32>
    %7 = arith.addf %4, %6 : vector<8x128xf32>
    %8 = math.sin %7 : vector<8x128xf32>
    %c0_5 = arith.constant 0 : index
    %c0_6 = arith.constant 0 : index
    %9 = vector.load %arg4[%c0_5, %c0_6] : memref<8x128xf32, #tpu.memory_space<vmem>>, vector<8x128xf32>
    tpu.vector_store %arg4[%c0_5, %c0_6], %8 {strides = array<i32>} : memref<8x128xf32, #tpu.memory_space<vmem>>, vector<8x128xf32>,
    return
  }
  func.func @transform_0(%arg0: i32) -> (i32, i32) {
    %c0_i32 = arith.constant 0 : i32
    %c0_i32_0 = arith.constant 0 : i32
    return %arg0, %c0_i32 : i32, i32
  }
  func.func @transform_1(%arg0: i32) -> (i32, i32) {
    %c0_i32 = arith.constant 0 : i32
    %c0_i32_0 = arith.constant 0 : i32
    %c0_i32_1 = arith.constant 0 : i32
    return %c0_i32, %c0_i32_0 : i32, i32
  }
  func.func @transform_2(%arg0: i32) -> (i32, i32) {
    %c0_i32 = arith.constant 0 : i32
    %c0_i32_0 = arith.constant 0 : i32
    %c0_i32_1 = arith.constant 0 : i32
    return %c0_i32, %c0_i32_0 : i32, i32
  }
  func.func @transform_3(%arg0: i32) -> (i32, i32) {
    %c0_i32 = arith.constant 0 : i32
    %c0_i32_0 = arith.constant 0 : i32
    return %arg0, %c0_i32 : i32, i32
  }
}

</mosaic_0001>

<bundles_post_ra>
// kernel: tpu_custom_call.1
= control target key start
LH: loop header
LB: loop body
LE: loop exit
PB: predicated region body
PF: predicated region fallthrough
CT: control target
= control target key end

     0   :  { %v201_v1 = vmov 0   ;;  %s262_s0 = inlined_call_operand.vmem [shape: f32[8,1], index: 0, kind: input, shape index: {}]   ;;  %s263_s1 = inlined_call_operand.vmem [shape: f32[1,128], index: 1, kind: input, shape index: {}]   ;;  %s264_s2 = inlined_call_operand.vmem [shape: f32[1,128], index: 2, kind: input, shape index: {}]   ;;  %s265_s3 = inlined_call_operand.hbm [shape: f32[8,128], index: 3, kind: output, shape index: {}]  }
   0x1   :  { %v15_v0 = vld [vmem:[%s262_s0] sm:$0xff]  ;;  %174 = vset.pattern.permute.xlu0 %v201_v1 }
   0x2   :  { %19 = vperm.xlu0 %174, %v15_v0  }
   0x3   :  { %8 = vsyncpa [#allocation3], 0  ;;  %v156_v2 = vld [vmem:[%s263_s1] ss:$0 sm:$0xff]  ;;  %v202_v18 = vmov 2102212464  }
   0x4   :  { %v157_v3 = vld [vmem:[%s264_s2] ss:$0 sm:$0xff]  ;;  %v203_v20 = vmov 920167782   ;;  %v204_v24 = vmov 1326507024  }
   0x5   :  { %v205_v26 = vmov 683565275   ;;  %v206_v28 = vmov 2475754826   ;;  %v207_v31 = vmov 2131351028  }
   0x6   :  { %s208_s0 = smov [#allocation2]  }
   0x7   :  { %s148_s1 = sshll.u32 %s208_s0, 4  ;;  %s149_s1 = int_to_ptr.vmem [resolvable:$true] %s148_s1 }
   0x8   :  { %s179_s2 = scalar_lea.vmem %s149_s1, 128  ;;  %p184_p1 = scmp.lt.s32.totalorder %s149_s1, %s149_s1 }
   0x9   :  { %p180_p0 = scmp.ne.s32.totalorder %s149_s1, %s179_s2  ;;  %p185_p2 = scmp.lt.s32.totalorder %s179_s2, %s179_s2 }
   0xb   :  { %p186_p3 = por %p185_p2, %p184_p1 }
   0xd   :  { %p187_p4 = pnand %p186_p3, %p180_p0 }
  0x7d   :  { %v20_v4 = vpop.permute.xlu0 %19 }
  0x7e   :  { %v28_v5 = vmul.f32 %v156_v2, %v20_v4 }
  0x80   :  { %v238_v6 = vadd.f32 %v157_v3, %v28_v5 }
  0x82   :  { %v40_v7 = vand.u32 2139095040, %v238_v6  ;;  %v37_v8 = vand.u32 2147483647, %v238_v6  ;;  %vm39_vm7 = vcmp.lt.s32.totalorder %v238_v6, 0  ;;  %vm129_vm12 = vweird.f32 %v238_v6 }
  0x84   :  { %v41_v9 = vshrl.u32 %v40_v7, 23  ;;  %v44_v11 = vand.u32 8388607, %v37_v8  ;;  %vm38_vm8 = vcmp.le.f32.partialorder %v37_v8, 0.7853982 }
  0x86   :  { %v158_v10 = vadd.s32 4294967169, %v41_v9  ;;  %v45_v14 = vor.u32 8388608, %v44_v11 }
  0x88   :  { %v47_v12 = vadd.s32 1, %v158_v10  ;;  %v85_v22 = vshll.u32 %v45_v14, 8 }
  0x8a   :  { %vm48_vm0 = vcmp.gt.s32.totalorder %v47_v12, 0 }
  0x8b   :  { %v49_v13 = vsel %vm48_vm0, %v47_v12, 0 }
  0x8c   :  { %v51_v15 = vand.u32 31, %v49_v13  ;;  %v50_v16 = vshrl.u32 %v49_v13, 5 }
  0x8e   :  { %v52_v17 = vsub.s32 32, %v51_v15  ;;  %v63_v19 = vshll.u32 %v202_v18, %v51_v15  ;;  %v66_v21 = vshll.u32 %v203_v20, %v51_v15  ;;  %v54_v27 = vshll.u32 %v205_v26, %v51_v15 }
  0x8f   :  { %v57_v30 = vshll.u32 %v206_v28, %v51_v15  ;;  %v60_v33 = vshll.u32 %v207_v31, %v51_v15  ;;  %vm72_vm1 = vcmp.lt.s32.totalorder %v50_v16, 4  ;;  %vm69_vm2 = vcmp.lt.s32.totalorder %v50_v16, 1 }
  0x90   :  { %v64_v23 = vshrl.u32 %v203_v20, %v52_v17  ;;  %v67_v25 = vshrl.u32 %v204_v24, %v52_v17  ;;  %v55_v29 = vshrl.u32 %v206_v28, %v52_v17  ;;  %v58_v32 = vshrl.u32 %v207_v31, %v52_v17 }
  0x91   :  { %v61_v34 = vshrl.u32 %v202_v18, %v52_v17  ;;  %v53_v38 = vshrl.u32 %v205_v26, %v52_v17  ;;  %vm70_vm3 = vcmp.lt.s32.totalorder %v50_v16, 2  ;;  %vm71_vm4 = vcmp.lt.s32.totalorder %v50_v16, 3 }
  0x92   :  { %v65_v35 = vor.u32 %v64_v23, %v63_v19  ;;  %v68_v36 = vor.u32 %v67_v25, %v66_v21  ;;  %v56_v37 = vor.u32 %v55_v29, %v54_v27  ;;  %v59_v39 = vor.u32 %v58_v32, %v57_v30 }
  0x93   :  { %v62_v40 = vor.u32 %v61_v34, %v60_v33 }
  0x94   :  { %v78_v41 = vsel %vm72_vm1, %v65_v35, 920167782  ;;  %v82_v42 = vsel %vm72_vm1, %v68_v36, 1326507024  ;;  %v77_v44 = vsel %vm69_vm2, %v56_v37, %v59_v39  ;;  %v73_v47 = vsel %vm69_vm2, %v53_v38, %v56_v37 }
  0x95   :  { %v74_v43 = vsel %vm72_vm1, %v62_v40, 2102212464  ;;  %v79_v45 = vsel %vm71_vm4, %v62_v40, %v78_v41  ;;  %v81_v46 = vsel %vm69_vm2, %v59_v39, %v62_v40  ;;  %v83_v50 = vsel %vm71_vm4, %v65_v35, %v82_v42 }
  0x96   :  { %v75_v48 = vsel %vm71_vm4, %v59_v39, %v74_v43  ;;  %v80_v49 = vsel %vm70_vm3, %v77_v44, %v79_v45  ;;  %v84_v51 = vsel %vm70_vm3, %v81_v46, %v83_v50 }
  0x97   :  { %v244_v52 = vmul.u32.u64.low %v85_v22, %v80_v49  ;;  %v245_v53 = vmul.u32.u64.high %v85_v22, %v80_v49, %v244_v52  ;;  %v247_v54 = vmul.u32.u64.low %v85_v22, %v84_v51  ;;  %v248_v55 = vmul.u32.u64.high %v85_v22, %v84_v51, %v247_v54 }
  0x98   :  { %v76_v56 = vsel %vm70_vm3, %v73_v47, %v75_v48 }
  0x99   :  { %v95_v57 = vadd.s32 1, %v245_v53  ;;  %v92_v58 = vmul.u32 %v85_v22, %v76_v56  ;;  %vm94_vm5 = vc.u32 %v248_v55, %v244_v52  ;;  %v93_v7 = vadd.s32 %v244_v52, %v248_v55 }
  0x9b   :  { %v96_v59 = vsel %vm94_vm5, %v95_v57, %v245_v53 }
  0x9c   :  { %v97_v60 = vadd.s32 %v96_v59, %v92_v58 }
  0x9e   :  { %v98_v61 = vadd.s32 536870912, %v97_v60 }
  0xa0   :  { %v99_v62 = vshrl.u32 %v98_v61, 30 }
  0xa2   :  { %v100_v63 = vshll.u32 %v99_v62, 30  ;;  %v123_v21 = vsub.s32 4, %v99_v62 }
  0xa4   :  { %v101_v0 = vsub.s32 %v97_v60, %v100_v63  ;;  %v124_v24 = vsel %vm39_vm7, %v123_v21, %v99_v62 }
  0xa5   :  { %v126_v25 = vsel %vm38_vm8, 0, %v124_v24 }
  0xa6   :  { %v103_v1 = vsub.s32 0, %v101_v0  ;;  %v130_v26 = vadd.s32 3, %v126_v25 }
  0xa8   :  { %v159_v2 = vmin.u32 %v103_v1, %v101_v0  ;;  %v131_v27 = vand.u32 3, %v130_v26 }
  0xaa   :  { %v105_v3 = vclz %v159_v2  ;;  %vm136_vm9 = vcmp.eq.s32.totalorder %v131_v27, 2  ;;  %vm133_vm10 = vcmp.eq.s32.totalorder %v131_v27, 0  ;;  %vm132_vm11 = vcmp.lt.s32.totalorder %v131_v27, 2 }
  0xac   :  { %v160_v4 = vadd.s32 4294967294, %v105_v3 }
  0xae   :  { %vm161_vm6 = vcmp.lt.s32.totalorder %v160_v4, 0 }
  0xaf   :  { %v108_v5 = vsel %vm161_vm6, 0, %v160_v4 }
  0xb0   :  { %v109_v9 = vsub.s32 32, %v108_v5  ;;  %v113_v10 = vsub.s32 4294967266, %v108_v5  ;;  %v110_v11 = vshll.u32 %v101_v0, %v108_v5 }
  0xb2   :  { %v111_v12 = vshrl.u32 %v93_v7, %v109_v9  ;;  %v114_v13 = vadd.s32 127, %v113_v10 }
  0xb4   :  { %v112_v14 = vor.u32 %v111_v12, %v110_v11  ;;  %v115_v15 = vshll.u32 %v114_v13, 23 }
  0xb6   :  { %v116_v16 = vor.u32 4788187, %v115_v15  ;;  %v119_v18 = vcvt.s32.f32 %v112_v14 }
  0xb8   :  { %v117_v17 = vand.u32 2147483647, %v116_v16 }
  0xba   :  { %v120_v19 = vmul.f32 %v119_v18, %v117_v17 }
  0xbc   :  { %v121_v20 = vxor.u32 2147483648, %v120_v19 }
  0xbe   :  { %v122_v22 = vsel %vm39_vm7, %v121_v20, %v120_v19 }
  0xbf   :  { %v125_v23 = vsel %vm38_vm8, %v238_v6, %v122_v22 }
  0xc0   :  { %175 = vcosq.f32 %v125_v23 }
  0xc1   :  { %177 = vsinq.f32 %v125_v23 }
  0xcd   :  { %v176_v28 = vpop.eup %175 }
  0xce   :  { %v178_v29 = vpop.eup %177  ;;  %v137_v30 = vxor.u32 2147483648, %v176_v28 }
  0xcf   :  { %v134_v31 = vxor.u32 2147483648, %v178_v29 }
  0xd0   :  { %v138_v32 = vsel %vm136_vm9, %v137_v30, %v178_v29 }
  0xd1   :  { %v135_v8 = vsel %vm133_vm10, %v176_v28, %v134_v31 }
  0xd2   :  { %v139_v33 = vsel %vm132_vm11, %v135_v8, %v138_v32 }
  0xd3   :  { %v140_v34 = vsel %vm129_vm12, nan, %v139_v33 }
  0xd4   :  { %141 = vst [vmem:[#allocation2] sm:$0xff] %v140_v34 }
  0xd5   :  { %190 = shalt.err (!%p187_p4)
}
  0xd6   :  { %151 = dma.vmem_to_hbm [thread:$0]  %s149_s1, 128, %s265_s3, [#allocation3]  }
  0xd7   :  { %199 = dma.done.wait [#allocation3], 128  }
  0xd8   :  { %200 = vsyncadd [#allocation3], 4294967168 }
  0xd9   :  { %155 = vsyncpa [#allocation3], 1 }

</bundles_post_ra>
